<compile_context>
chip_gen: v7x
topology: tpu7x:2x2x1
jax: 0.10.0
libtpu: 0.0.40
codegen_flags: <defaults>
</compile_context>

<pallas_src>
import functools

import jax
import jax.numpy as jnp
from jax import lax
from jax.experimental import pallas as pl
from jax.experimental.pallas import tpu as pltpu

_LANE = 128
_SUBLANE = 8
_MAX_TILE_LANES = 131072      # (3, 131072) f32 block: 1.5 MiB HBM payload, 4 MiB VMEM (8-sublane padded)
_MAX_TILE_ROWS = 2048         # (2048, 3) f32 block: 1 MiB VMEM (128-lane padded)
_VMEM_LIMIT_BYTES = 32 * 1024 * 1024


def _cdiv(a, b):
    return -(-a // b)


def _round_up(x, m):
    return _cdiv(x, m) * m


def _pick_tile(extent, unit, max_tile):
    """Largest tile that (a) is a multiple of `unit`, (b) is <= max_tile, and
    (c) splits `extent` into >= 2 grid steps whenever extent > unit, so the
    'parallel' grid axis can shard across both v7x TensorCores."""
    half = _round_up(_cdiv(extent, 2), unit)
    return max(unit, min(_round_up(max_tile, unit), half))


# ------------------------------ kernels -------------------------------------


def _lorenz_rows_kernel(params_ref, state_ref, out_ref):
    """state_ref / out_ref: (tile_rows, 3) VMEM blocks; columns = (x, y, z)."""
    sigma = params_ref[0]
    rho = params_ref[1]
    beta = params_ref[2]
    s = state_ref[...].astype(jnp.float32)
    x, y, z = s[:, 0:1], s[:, 1:2], s[:, 2:3]
    dx = sigma * (y - x)
    dy = x * (rho - z) - y
    dz = x * y - beta * z
    out_ref[...] = jnp.concatenate([dx, dy, dz], axis=1).astype(out_ref.dtype)


def _lorenz_lanedense_kernel(params_ref, state_ref, out_ref):
    """state_ref / out_ref: (3, tile_lanes) VMEM blocks; rows = (x, y, z)."""
    sigma = params_ref[0]
    rho = params_ref[1]
    beta = params_ref[2]
    x = state_ref[0:1, :].astype(jnp.float32)
    y = state_ref[1:2, :].astype(jnp.float32)
    z = state_ref[2:3, :].astype(jnp.float32)
    dt = out_ref.dtype
    out_ref[0:1, :] = (sigma * (y - x)).astype(dt)
    out_ref[1:2, :] = (x * (rho - z) - y).astype(dt)
    out_ref[2:3, :] = (x * y - beta * z).astype(dt)


def _lorenz_euler_kernel(num_steps, params_ref, state_ref, out_ref):
    """num_steps fused explicit-Euler steps; state stays on-chip in between."""
    sigma = params_ref[0]
    rho = params_ref[1]
    beta = params_ref[2]
    dt = params_ref[3]
    s0 = state_ref[...].astype(jnp.float32)        # (3, tile_lanes)

    def step(_, s):
        x, y, z = s[0:1, :], s[1:2, :], s[2:3, :]
        ds = jnp.concatenate(
            [sigma * (y - x), x * (rho - z) - y, x * y - beta * z], axis=0)
        return s + dt * ds

    s = lax.fori_loop(0, num_steps, step, s0)
    out_ref[...] = s.astype(out_ref.dtype)


# ------------------------------ wrappers ------------------------------------


def ode_lorenz_forward(t, state, *, sigma, rho, beta,
                       max_tile_rows=_MAX_TILE_ROWS):
    """PyTorch-parity entry point: state (B, 3) -> (B, 3), no relayouts."""
    del t  # unused, API parity with the PyTorch module
    assert state.ndim == 2 and state.shape[1] == 3, state.shape
    b = state.shape[0]
    tile_rows = _pick_tile(b, _SUBLANE, max_tile_rows)
    if b < _SUBLANE:               # block dim must be the full extent then
        tile_rows = b
    n_tiles = _cdiv(b, tile_rows)
    params = jnp.asarray([sigma, rho, beta], dtype=jnp.float32)
    block = (tile_rows, 3)
    return pl.pallas_call(
        _lorenz_rows_kernel,
        out_shape=jax.ShapeDtypeStruct((b, 3), state.dtype),
        grid=(n_tiles,),
        in_specs=[
            pl.BlockSpec(memory_space=pltpu.MemorySpace.SMEM),   # params
            pl.BlockSpec(block, lambda i: (i, 0)),               # state tile
        ],
        out_specs=pl.BlockSpec(block, lambda i: (i, 0)),
        compiler_params=pltpu.CompilerParams(
            dimension_semantics=("parallel",),
            vmem_limit_bytes=_VMEM_LIMIT_BYTES,
        ),
    )(params, state)


def lorenz_rhs_lanedense(t, state_t, *, sigma, rho, beta,
                         max_tile_lanes=_MAX_TILE_LANES):
    """Lorenz RHS on a lane-dense (3, B) state -> (3, B).

    Recommended contract: batch on TPU lanes, no pads/reshapes/transposes;
    ragged tiles handled by Pallas's masked partial-block stores."""
    del t
    assert state_t.ndim == 2 and state_t.shape[0] == 3, state_t.shape
    b = state_t.shape[1]
    tile_lanes = _pick_tile(b, _LANE, max_tile_lanes)
    if b < _LANE:
        tile_lanes = b
    n_tiles = _cdiv(b, tile_lanes)
    params = jnp.asarray([sigma, rho, beta], dtype=jnp.float32)
    block = (3, tile_lanes)
    return pl.pallas_call(
        _lorenz_lanedense_kernel,
        out_shape=jax.ShapeDtypeStruct((3, b), state_t.dtype),
        grid=(n_tiles,),
        in_specs=[
            pl.BlockSpec(memory_space=pltpu.MemorySpace.SMEM),   # params
            pl.BlockSpec(block, lambda i: (0, i)),               # state tile
        ],
        out_specs=pl.BlockSpec(block, lambda i: (0, i)),
        compiler_params=pltpu.CompilerParams(
            dimension_semantics=("parallel",),
            vmem_limit_bytes=_VMEM_LIMIT_BYTES,
        ),
    )(params, state_t)


def lorenz_euler_steps_lanedense(state_t, *, sigma, rho, beta, dt, num_steps,
                                 max_tile_lanes=8192):
    """num_steps fused explicit-Euler steps on a lane-dense (3, B) state.

    One HBM read + one HBM write per `num_steps` RHS evaluations."""
    assert state_t.ndim == 2 and state_t.shape[0] == 3, state_t.shape
    b = state_t.shape[1]
    tile_lanes = _pick_tile(b, _LANE, max_tile_lanes)
    if b < _LANE:
        tile_lanes = b
    n_tiles = _cdiv(b, tile_lanes)
    params = jnp.asarray([sigma, rho, beta, dt], dtype=jnp.float32)
    block = (3, tile_lanes)
    return pl.pallas_call(
        functools.partial(_lorenz_euler_kernel, num_steps),
        out_shape=jax.ShapeDtypeStruct((3, b), state_t.dtype),
        grid=(n_tiles,),
        in_specs=[
            pl.BlockSpec(memory_space=pltpu.MemorySpace.SMEM),   # params
            pl.BlockSpec(block, lambda i: (0, i)),               # state tile
        ],
        out_specs=pl.BlockSpec(block, lambda i: (0, i)),
        compiler_params=pltpu.CompilerParams(
            dimension_semantics=("parallel",),
            vmem_limit_bytes=_VMEM_LIMIT_BYTES,
        ),
    )(params, state_t)


# ----------------------------- references ----------------------------------


def _reference_rows(state, sigma, rho, beta):
    x, y, z = state[:, 0], state[:, 1], state[:, 2]
    return jnp.stack(
        [sigma * (y - x), x * (rho - z) - y, x * y - beta * z], axis=1)


def _reference_lanedense(state_t, sigma, rho, beta):
    x, y, z = state_t[0], state_t[1], state_t[2]
    return jnp.stack(
        [sigma * (y - x), x * (rho - z) - y, x * y - beta * z], axis=0)


if __name__ == "__main__":
    sigma, rho, beta = 10.0, 28.0, 8.0 / 3.0
    key = jax.random.PRNGKey(0)
    k1, k2, k3, k4 = jax.random.split(key, 4)

    # 1) PyTorch-parity (B, 3) contract, B = 8 (single full block).
    state = jax.random.normal(k1, (8, 3), dtype=jnp.float32)
    out = jax.block_until_ready(
        ode_lorenz_forward(0.0, state, sigma=sigma, rho=rho, beta=beta))
    assert out.shape == (8, 3), out.shape
    assert jnp.allclose(out, _reference_rows(state, sigma, rho, beta),
                        rtol=1e-6, atol=1e-6)

    # 1b) Ragged batch B = 13: two grid steps, masked partial last block.
    state = jax.random.normal(k2, (13, 3), dtype=jnp.float32)
    out = jax.block_until_ready(
        ode_lorenz_forward(0.0, state, sigma=sigma, rho=rho, beta=beta))
    assert out.shape == (13, 3), out.shape
    assert jnp.allclose(out, _reference_rows(state, sigma, rho, beta),
                        rtol=1e-6, atol=1e-6)

    # 2) Lane-dense (3, B) contract, B = 1024: split into 2 tiles (megacore).
    state_t = jax.random.normal(k3, (3, 1024), dtype=jnp.float32)
    out_t = jax.block_until_ready(
        lorenz_rhs_lanedense(0.0, state_t, sigma=sigma, rho=rho, beta=beta))
    assert out_t.shape == (3, 1024), out_t.shape
    assert jnp.allclose(out_t, _reference_lanedense(state_t, sigma, rho, beta),
                        rtol=1e-6, atol=1e-6)

    # 2b) Ragged lane-dense B = 1029: masked partial last tile.
    state_t2 = jax.random.normal(k4, (3, 1029), dtype=jnp.float32)
    out_t2 = jax.block_until_ready(
        lorenz_rhs_lanedense(0.0, state_t2, sigma=sigma, rho=rho, beta=beta))
    assert out_t2.shape == (3, 1029), out_t2.shape
    assert jnp.allclose(out_t2, _reference_lanedense(state_t2, sigma, rho, beta),
                        rtol=1e-6, atol=1e-6)

    # 3) Fused multi-step Euler integration (the big lever for ODE use).
    dt_step, n_steps = 0.01, 5
    out_e = jax.block_until_ready(
        lorenz_euler_steps_lanedense(state_t, sigma=sigma, rho=rho, beta=beta,
                                     dt=dt_step, num_steps=n_steps))
    ref_e = state_t
    for _ in range(n_steps):
        ref_e = ref_e + dt_step * _reference_lanedense(ref_e, sigma, rho, beta)
    assert out_e.shape == state_t.shape, out_e.shape
    assert jnp.allclose(out_e, ref_e, rtol=1e-5, atol=1e-5)

    print("KERNEL_OK")
</pallas_src>

<mosaic_0001>
module attributes {stable_mosaic.version = 11 : i64} {
  func.func @_lorenz_rows_kernel(%arg0: i32, %arg1: memref<3xf32, #tpu.memory_space<smem>>, %arg2: memref<8x3xf32, #tpu.memory_space<vmem>>, %arg3: memref<8x3xf32, #tpu.memory_space<vmem>>) attributes {dimension_semantics = [#tpu.dimension_semantics<parallel>], iteration_bounds = array<i64: 1>, scalar_prefetch = 0 : i64, scratch_operands = 0 : i64, tpu.core_type = #tpu.core_type<tc>, window_params = [{transform_indices = @transform_0, window_bounds = array<i64: 3>}, {transform_indices = @transform_1, window_bounds = array<i64: 8, 3>}, {transform_indices = @transform_2, window_bounds = array<i64: 8, 3>}]} {
    %c0 = arith.constant 0 : index
    %0 = memref.load %arg1[%c0] : memref<3xf32, #tpu.memory_space<smem>>
    %c1 = arith.constant 1 : index
    %1 = memref.load %arg1[%c1] : memref<3xf32, #tpu.memory_space<smem>>
    %c2 = arith.constant 2 : index
    %2 = memref.load %arg1[%c2] : memref<3xf32, #tpu.memory_space<smem>>
    %c0_0 = arith.constant 0 : index
    %c0_1 = arith.constant 0 : index
    %3 = vector.load %arg2[%c0_0, %c0_1] : memref<8x3xf32, #tpu.memory_space<vmem>>, vector<8x3xf32>
    %4 = vector.extract_strided_slice %3 {offsets = [0, 0], sizes = [8, 1], strides = [1, 1]} : vector<8x3xf32> to vector<8x1xf32>
    %5 = vector.extract_strided_slice %3 {offsets = [0, 1], sizes = [8, 1], strides = [1, 1]} : vector<8x3xf32> to vector<8x1xf32>
    %6 = vector.extract_strided_slice %3 {offsets = [0, 2], sizes = [8, 1], strides = [1, 1]} : vector<8x3xf32> to vector<8x1xf32>
    %7 = arith.subf %5, %4 : vector<8x1xf32>
    %8 = vector.broadcast %0 : f32 to vector<8x1xf32>
    %9 = arith.mulf %8, %7 : vector<8x1xf32>
    %10 = vector.broadcast %1 : f32 to vector<8x1xf32>
    %11 = arith.subf %10, %6 : vector<8x1xf32>
    %12 = arith.mulf %4, %11 : vector<8x1xf32>
    %13 = arith.subf %12, %5 : vector<8x1xf32>
    %14 = arith.mulf %4, %5 : vector<8x1xf32>
    %15 = vector.broadcast %2 : f32 to vector<8x1xf32>
    %16 = arith.mulf %15, %6 : vector<8x1xf32>
    %17 = arith.subf %14, %16 : vector<8x1xf32>
    %18 = tpu.concatenate %9, %13, %17 in 1 : vector<8x1xf32>, vector<8x1xf32>, vector<8x1xf32> -> vector<8x3xf32>
    %c0_2 = arith.constant 0 : index
    %c0_3 = arith.constant 0 : index
    %19 = vector.load %arg3[%c0_2, %c0_3] : memref<8x3xf32, #tpu.memory_space<vmem>>, vector<8x3xf32>
    tpu.vector_store %arg3[%c0_2, %c0_3], %18 {strides = array<i32>} : memref<8x3xf32, #tpu.memory_space<vmem>>, vector<8x3xf32>,
    return
  }
  func.func @transform_0(%arg0: i32) -> i32 {
    %c0_i32 = arith.constant 0 : i32
    %c0_i32_0 = arith.constant 0 : i32
    return %c0_i32 : i32
  }
  func.func @transform_1(%arg0: i32) -> (i32, i32) {
    %c0_i32 = arith.constant 0 : i32
    %c0_i32_0 = arith.constant 0 : i32
    return %arg0, %c0_i32 : i32, i32
  }
  func.func @transform_2(%arg0: i32) -> (i32, i32) {
    %c0_i32 = arith.constant 0 : i32
    %c0_i32_0 = arith.constant 0 : i32
    return %arg0, %c0_i32 : i32, i32
  }
}

</mosaic_0001>

<bundles_post_ra>
// kernel: tpu_custom_call.1
= control target key start
LH: loop header
LB: loop body
LE: loop exit
PB: predicated region body
PF: predicated region fallthrough
CT: control target
= control target key end

     0   :  { %7 = vsyncpa [#allocation3], 0  ;;  %s127_s0 = inlined_call_operand.vmem [shape: f32[3], index: 0, kind: input, shape index: {}]   ;;  %s128_s1 = inlined_call_operand.vmem [shape: f32[8,3], index: 1, kind: input, shape index: {}]   ;;  %s129_s2 = inlined_call_operand.vmem [shape: f32[8,3], index: 2, kind: output, shape index: {}]  }
   0x1   :  { %s14_s11 = sshll.u32 %s127_s0, 4  ;;  %s15_s11 = int_to_ptr.vmem [resolvable:$true] %s14_s11 }
   0x2   :  { %s84_s12 = scalar_lea.vmem %s15_s11, 16  ;;  %p89_p1 = scmp.lt.s32.totalorder %s15_s11, %s15_s11 }
   0x3   :  { %p85_p0 = scmp.ne.s32.totalorder %s15_s11, %s84_s12  ;;  %p90_p2 = scmp.lt.s32.totalorder %s84_s12, %s84_s12 }
   0x5   :  { %p91_p3 = por %p90_p2, %p89_p1 }
   0x7   :  { %p92_p4 = pnand %p91_p3, %p85_p0 }
   0x9   :  { %95 = shalt.err (!%p92_p4)
}
   0xa   :  { %s98_s13 = smov [#allocation2]  }
   0xb   :  { %17 = dma.vmem_to_smem %s15_s11, 16, %s98_s13, [#allocation3]  }
   0xc   :  { %96 = dma.done.wait [#allocation3], 16  }
   0xd   :  { %97 = vsyncadd [#allocation3], 4294967280 }
   0xe   :  { %23 = sfence }
   0xf   :  { %v27_v0 = vld [vmem:[%s128_s1] sm:$0xff]  ;;  %s99_s16 = smov 1   ;;  %s100_s0 = smov 127   ;;  %vm66_vm0 = vcmask 7168   ;;  %vm68_vm1 = vcmask 15360   ;;  %vm70_vm2 = vcmask 23552  }
  0x10   :  { %29 = vrot.lane.b32.xlu0 %v27_v0, %s99_s16  ;;  %42 = vrot.lane.b32.xlu1 %v27_v0, %s100_s0  ;;  %s77_s17 = sld [smem:[#allocation2 + $0x1]]  ;;  %s78_s18 = sld [smem:[#allocation2 + $0x2]] }
  0x11   :  { %s101_s19 = smov 126   ;;  %s24_s20 = sld [smem:[#allocation2]] }
  0x12   :  { %s102_s1 = smov 2  }
  0x16   :  { %v35_v1 = vstv %s77_s17  ;;  %v47_v3 = vstv %s78_s18 }
  0x17   :  { %v36_v2 = vsub.f32 %v35_v1, %v27_v0  ;;  %v48_v4 = vmul.f32 %v47_v3, %v27_v0  ;;  %v33_v6 = vstv %s24_s20 }
  0x19   :  { %38 = vrot.lane.b32.xlu0 %v36_v2, %s101_s19  ;;  %50 = vrot.lane.b32.xlu1 %v48_v4, %s101_s19 }
  0x82   :  { %v30_v5 = vpop.permute.xlu0 %29  ;;  %v43_v9 = vpop.permute.xlu1 %42 }
  0x83   :  { %v32_v7 = vsub.f32 %v27_v0, %v30_v5  ;;  %v46_v10 = vmul.f32 %v43_v9, %v27_v0 }
  0x85   :  { %v34_v8 = vmul.f32 %v33_v6, %v32_v7 }
  0x87   :  { %55 = vrot.lane.b32.xlu0 %v34_v8, %s100_s0 }
  0x8b   :  { %v39_v11 = vpop.permute.xlu0 %38  ;;  %v51_v13 = vpop.permute.xlu1 %50 }
  0x8c   :  { %v41_v12 = vmul.f32 %v39_v11, %v27_v0  ;;  %v53_v14 = vsub.f32 %v46_v10, %v51_v13 }
  0x8e   :  { %v45_v15 = vsub.f32 %v41_v12, %v43_v9  ;;  %63 = vrot.lane.b32.xlu0 %v53_v14, %s102_s1 }
  0x90   :  { %59 = vrot.lane.b32.xlu1 %v45_v15, %s99_s16 }
  0xf9   :  { %v56_v16 = vpop.permute.xlu0 %55 }
 0x100   :  { %v64_v18 = vpop.permute.xlu0 %63 }
 0x102   :  { %v60_v17 = vpop.permute.xlu1 %59 }
 0x103   :  { %v67_v19 = vsel %vm66_vm0, %v56_v16, %v60_v17 }
 0x104   :  { %v69_v20 = vsel %vm68_vm1, %v67_v19, %v64_v18 }
 0x105   :  { %71 = vst.msk [vmem:[%s129_s2] sm:$0xff] %vm70_vm2, %v69_v20 }
 0x106   :  { %76 = vsyncpa [#allocation3], 1 }

</bundles_post_ra>
